<compile_context>
chip_gen: v5e
topology: v5e:2x2
jax: 0.10.0
libtpu: 0.0.40
codegen_flags: <defaults>
</compile_context>

<pallas_src>
import jax
import jax.numpy as jnp
from jax.experimental import pallas as pl
from jax.experimental.pallas import tpu as pltpu


def _round_up(x, m):
    return ((x + m - 1) // m) * m


def _balanced_tile(dim, max_tile, align):
    """Pick an aligned tile that splits `dim` into the fewest balanced chunks
    of size <= max_tile (minimizes padding waste for awkward sizes)."""
    max_tile = max(align, _round_up(min(max_tile, dim), align))
    n_chunks = -(-dim // max_tile)
    chunk = -(-dim // n_chunks)
    return _round_up(chunk, align)


def _linear_kernel(x_ref, w_ref, b_ref, o_ref):
    # x_ref: (tm, tk) bf16    w_ref: (tk, tn) bf16
    # b_ref: (1, tn)  f32     o_ref: (tm, tn) f32 (resident accumulator)
    @pl.when(pl.program_id(2) == 0)
    def _():
        # Seed the resident output block with the bias.
        o_ref[...] = jnp.broadcast_to(b_ref[...], o_ref.shape)

    o_ref[...] += jnp.dot(
        x_ref[...], w_ref[...], preferred_element_type=jnp.float32
    )


def prepare_linear_params(
    weight, bias, *, tile_n=512, tile_k=1024, compute_dtype=jnp.bfloat16
):
    """One-time prep: transpose weight to (K, N), cast to compute_dtype, pad to
    tile multiples; reshape/pad bias to (1, Np) f32.  Do this at module init so
    the per-call path only touches x."""
    N, K = weight.shape
    assert bias.shape == (N,), bias.shape

    tn = _balanced_tile(N, tile_n, 128)
    tk = _balanced_tile(K, tile_k, 128)
    Np = _round_up(N, tn)
    Kp = _round_up(K, tk)

    w_t = weight.T.astype(compute_dtype)              # (K, N)
    if (Kp, Np) != (K, N):
        w_t = jnp.pad(w_t, ((0, Kp - K), (0, Np - N)))

    bias2d = bias.reshape(1, N).astype(jnp.float32)
    if Np != N:
        bias2d = jnp.pad(bias2d, ((0, 0), (0, Np - N)))

    return {
        "w_t": w_t, "bias2d": bias2d,
        "N": N, "K": K, "Np": Np, "Kp": Kp,
        "tn": tn, "tk": tk,
        "compute_dtype": compute_dtype,
    }


def lrp_linear_forward_prepared(x, params, *, tile_b=512):
    """Forward of LRPLinear using pre-prepared (transposed/padded/bf16) weights.

    x : (B, in_features).  Output: (B, out_features) float32.
    """
    B, K = x.shape
    assert K == params["K"], (K, params["K"])
    compute_dtype = params["compute_dtype"]
    tn, tk = params["tn"], params["tk"]
    Np, Kp = params["Np"], params["Kp"]
    N = params["N"]

    # bf16 min sublane tile is (16, 128); f32 is (8, 128).
    m_align = 16 if compute_dtype == jnp.bfloat16 else 8
    tm = _balanced_tile(B, tile_b, m_align)
    Bp = _round_up(B, tm)

    x_c = x.astype(compute_dtype)
    if (Bp, Kp) != (B, K):
        x_c = jnp.pad(x_c, ((0, Bp - B), (0, Kp - K)))

    grid = (Bp // tm, Np // tn, Kp // tk)

    cd_size = jnp.dtype(compute_dtype).itemsize
    # Double-buffered x/w/bias tiles + double-buffered f32 output block.
    working_set = (
        2 * tm * tk * cd_size
        + 2 * tk * tn * cd_size
        + 2 * tn * 4
        + 2 * tm * tn * 4
    )
    vmem_limit = min(96 * 1024 * 1024,
                     max(32 * 1024 * 1024, int(1.5 * working_set)))

    flops = 2 * Bp * Kp * Np
    bytes_accessed = int(
        Bp * Kp * cd_size            # x (read once per N-block pass)
        + Kp * Np * cd_size          # weight
        + Np * 4                     # bias
        + Bp * Np * 4                # output
    )

    out = pl.pallas_call(
        _linear_kernel,
        out_shape=jax.ShapeDtypeStruct((Bp, Np), jnp.float32),
        grid_spec=pltpu.PrefetchScalarGridSpec(
            num_scalar_prefetch=0,
            grid=grid,
            in_specs=[
                pl.BlockSpec((tm, tk), lambda i, j, k: (i, k)),
                pl.BlockSpec((tk, tn), lambda i, j, k: (k, j)),
                pl.BlockSpec((1, tn), lambda i, j, k: (0, j)),
            ],
            out_specs=pl.BlockSpec((tm, tn), lambda i, j, k: (i, j)),
        ),
        compiler_params=pltpu.CompilerParams(
            dimension_semantics=("parallel", "parallel", "arbitrary"),
            vmem_limit_bytes=vmem_limit,
        ),
        cost_estimate=pl.CostEstimate(
            flops=int(flops), bytes_accessed=bytes_accessed, transcendentals=0
        ),
    )(x_c, params["w_t"], params["bias2d"])

    if (Bp, Np) != (B, N):
        out = out[:B, :N]
    return out


def lrp_linear_forward(x, weight, bias, *, tile_b=512, tile_n=512, tile_k=1024,
                       compute_dtype=jnp.bfloat16):
    """Convenience one-shot form (prep cost paid per call; prefer the module /
    prepare_linear_params for repeated calls with the same weights)."""
    params = prepare_linear_params(
        weight, bias, tile_n=tile_n, tile_k=tile_k, compute_dtype=compute_dtype
    )
    return lrp_linear_forward_prepared(x, params, tile_b=tile_b)


class LRPLinearJax:
    """Minimal JAX counterpart of the PyTorch LRPLinear module (forward only)."""

    def __init__(self, in_features, out_features, key, *,
                 compute_dtype=jnp.bfloat16, tile_b=512, tile_n=512, tile_k=1024):
        self.in_features = in_features
        self.out_features = out_features
        kw, kb = jax.random.split(key)
        # torch.randn equivalents (standard normal), deterministic from key.
        self.weight = jax.random.normal(kw, (out_features, in_features), jnp.float32)
        self.bias = jax.random.normal(kb, (out_features,), jnp.float32)
        # One-time weight transpose / pad / cast (static across forward calls).
        self._params = prepare_linear_params(
            self.weight, self.bias,
            tile_n=tile_n, tile_k=tile_k, compute_dtype=compute_dtype,
        )
        self._tile_b = tile_b
        self.last_input = None
        self.last_output = None

    def __call__(self, x):
        self.last_input = x
        out = lrp_linear_forward_prepared(x, self._params, tile_b=self._tile_b)
        self.last_output = out
        return out
    # TODO(synk): relprop (LRP backward relevance pass) is not part of forward();
    # not implemented here.


if __name__ == "__main__":
    key = jax.random.PRNGKey(0)
    k_x, k_mod, k_x2, k_w2, k_b2 = jax.random.split(key, 5)

    # Small module-consistent test (matches the PyTorch spec shapes).
    batch, in_features, out_features = 8, 32, 32
    x = jax.random.normal(k_x, (batch, in_features), jnp.float32)

    module = LRPLinearJax(in_features, out_features, k_mod)
    out = jax.block_until_ready(module(x))
    assert out.shape == (batch, out_features)

    # Reference in the same precision the MXU sees (bf16 operands, f32 accumulate).
    xb = x.astype(jnp.bfloat16).astype(jnp.float32)
    wb = module.weight.T.astype(jnp.bfloat16).astype(jnp.float32)
    ref_bf16 = xb @ wb + module.bias
    assert jnp.allclose(out, ref_bf16, atol=1e-2, rtol=1e-2)
    # Loose sanity check against the full-f32 reference.
    ref_f32 = x @ module.weight.T + module.bias
    assert jnp.allclose(out, ref_f32, atol=0.5, rtol=0.1)

    # Moderate test exercising M/N/K tiling, the k-reduction loop, and the
    # balanced-tile padding heuristic (B=160 with tile_b=128 -> tm=80, no waste).
    B2, K2, N2 = 160, 384, 256
    x2 = jax.random.normal(k_x2, (B2, K2), jnp.float32)
    w2 = jax.random.normal(k_w2, (N2, K2), jnp.float32)
    b2 = jax.random.normal(k_b2, (N2,), jnp.float32)
    out2 = jax.block_until_ready(
        lrp_linear_forward(x2, w2, b2, tile_b=128, tile_n=128, tile_k=128)
    )
    ref2 = (x2.astype(jnp.bfloat16).astype(jnp.float32)
            @ w2.T.astype(jnp.bfloat16).astype(jnp.float32)) + b2
    assert out2.shape == (B2, N2)
    assert jnp.allclose(out2, ref2, atol=5e-2, rtol=1e-2)

    print("KERNEL_OK")
</pallas_src>

<mosaic_0001>
module attributes {stable_mosaic.version = 11 : i64} {
  func.func @_linear_kernel(%arg0: i32, %arg1: i32, %arg2: i32, %arg3: memref<16x128xbf16, #tpu.memory_space<vmem>>, %arg4: memref<128x128xbf16, #tpu.memory_space<vmem>>, %arg5: memref<1x128xf32, #tpu.memory_space<vmem>>, %arg6: memref<16x128xf32, #tpu.memory_space<vmem>>) attributes {dimension_semantics = [#tpu.dimension_semantics<parallel>, #tpu.dimension_semantics<parallel>, #tpu.dimension_semantics<arbitrary>], iteration_bounds = array<i64: 1, 1, 1>, scalar_prefetch = 0 : i64, scratch_operands = 0 : i64, tpu.core_type = #tpu.core_type<tc>, window_params = [{transform_indices = @transform_0, window_bounds = array<i64: 16, 128>}, {transform_indices = @transform_1, window_bounds = array<i64: 128, 128>}, {transform_indices = @transform_2, window_bounds = array<i64: 1, 128>}, {transform_indices = @transform_3, window_bounds = array<i64: 16, 128>}]} {
    %c0_i32 = arith.constant 0 : i32
    %0 = arith.cmpi eq, %arg2, %c0_i32 : i32
    %1 = arith.extui %0 : i1 to i32
    %c0_i32_0 = arith.constant 0 : i32
    %2 = arith.cmpi ne, %1, %c0_i32_0 : i32
    scf.if %2 {
      %c0_8 = arith.constant 0 : index
      %c0_9 = arith.constant 0 : index
      %9 = vector.load %arg5[%c0_8, %c0_9] : memref<1x128xf32, #tpu.memory_space<vmem>>, vector<1x128xf32>
      %10 = vector.shape_cast %9 : vector<1x128xf32> to vector<1x128xf32>
      %11 = vector.broadcast %10 : vector<1x128xf32> to vector<16x128xf32>
      %c0_10 = arith.constant 0 : index
      %c0_11 = arith.constant 0 : index
      %12 = vector.load %arg6[%c0_10, %c0_11] : memref<16x128xf32, #tpu.memory_space<vmem>>, vector<16x128xf32>
      tpu.vector_store %arg6[%c0_10, %c0_11], %11 {strides = array<i32>} : memref<16x128xf32, #tpu.memory_space<vmem>>, vector<16x128xf32>,
    } else {
    }
    %c0 = arith.constant 0 : index
    %c0_1 = arith.constant 0 : index
    %3 = vector.load %arg6[%c0, %c0_1] : memref<16x128xf32, #tpu.memory_space<vmem>>, vector<16x128xf32>
    %c0_2 = arith.constant 0 : index
    %c0_3 = arith.constant 0 : index
    %4 = vector.load %arg3[%c0_2, %c0_3] : memref<16x128xbf16, #tpu.memory_space<vmem>>, vector<16x128xbf16>
    %c0_4 = arith.constant 0 : index
    %c0_5 = arith.constant 0 : index
    %5 = vector.load %arg4[%c0_4, %c0_5] : memref<128x128xbf16, #tpu.memory_space<vmem>>, vector<128x128xbf16>
    %cst = arith.constant dense<0.000000e+00> : vector<16x128xf32>
    %6 = tpu.matmul %4, %5, %cst {dimension_numbers = #tpu.dot_dimension_numbers<[1], [0], [0], [1], [0, 0, 1, 1], [], []>} : vector<16x128xbf16>, vector<128x128xbf16>, vector<16x128xf32> -> vector<16x128xf32>
    %7 = arith.addf %3, %6 : vector<16x128xf32>
    %c0_6 = arith.constant 0 : index
    %c0_7 = arith.constant 0 : index
    %8 = vector.load %arg6[%c0_6, %c0_7] : memref<16x128xf32, #tpu.memory_space<vmem>>, vector<16x128xf32>
    tpu.vector_store %arg6[%c0_6, %c0_7], %7 {strides = array<i32>} : memref<16x128xf32, #tpu.memory_space<vmem>>, vector<16x128xf32>,
    return
  }
  func.func @transform_0(%arg0: i32, %arg1: i32, %arg2: i32) -> (i32, i32) {
    %c0_i32 = arith.constant 0 : i32
    return %arg0, %arg2 : i32, i32
  }
  func.func @transform_1(%arg0: i32, %arg1: i32, %arg2: i32) -> (i32, i32) {
    %c0_i32 = arith.constant 0 : i32
    return %arg2, %arg1 : i32, i32
  }
  func.func @transform_2(%arg0: i32, %arg1: i32, %arg2: i32) -> (i32, i32) {
    %c0_i32 = arith.constant 0 : i32
    %c0_i32_0 = arith.constant 0 : i32
    return %c0_i32, %arg1 : i32, i32
  }
  func.func @transform_3(%arg0: i32, %arg1: i32, %arg2: i32) -> (i32, i32) {
    %c0_i32 = arith.constant 0 : i32
    return %arg0, %arg1 : i32, i32
  }
}

</mosaic_0001>

<bundles_post_ra>
// kernel: tpu_custom_call.1
= control target key start
LH: loop header
LB: loop body
LE: loop exit
PB: predicated region body
PF: predicated region fallthrough
CT: control target
= control target key end

     0   :  { %8 = vsyncpa [#allocation3], 0  ;;  %s339_s0 = inlined_call_operand.hbm [shape: bf16[16,128], index: 0, kind: input, shape index: {}]   ;;  %s340_s1 = inlined_call_operand.hbm [shape: bf16[128,128], index: 1, kind: input, shape index: {}]   ;;  %s341_s2 = inlined_call_operand.vmem [shape: f32[1,128], index: 2, kind: input, shape index: {}]   ;;  %s342_s3 = inlined_call_operand.hbm [shape: f32[16,128], index: 3, kind: output, shape index: {}]  }
   0x1   :  { %9 = vsyncpa [#allocation6], 0 }
   0x2   :  { %10 = vsyncpa [#allocation4], 0  ;;  %s15_s14 = sshll.u32 %s339_s0, 4  ;;  %s300_s15 = smov [#allocation2]   ;;  %s16_s14 = int_to_ptr.hbm [resolvable:$true] %s15_s14 }
   0x3   :  { %s17_s16 = sshll.u32 %s300_s15, 4  ;;  %s28_s19 = sshll.u32 %s340_s1, 4  ;;  %s18_s16 = int_to_ptr.vmem [resolvable:$true] %s17_s16  ;;  %s29_s19 = int_to_ptr.hbm [resolvable:$true] %s28_s19 }
   0x4   :  { %s301_s20 = smov 64   ;;  %s302_s21 = smov 4  }
   0x5   :  { %23 = dma.hbm_to_vmem [thread:$0]  %s16_s14, 128, %s18_s16, [#allocation3], %s301_s20, %s301_s20, %s302_s21  }
   0x6   :  { %s303_s22 = smov [#allocation5]  }
   0x7   :  { %s30_s23 = sshll.u32 %s303_s22, 4  ;;  %s31_s23 = int_to_ptr.vmem [resolvable:$true] %s30_s23 }
   0x8   :  { %36 = dma.hbm_to_vmem [thread:$0]  %s29_s19, 1024, %s31_s23, [#allocation6], %s301_s20, %s301_s20, %s302_s21  }
   0x9   :  { %294 = dma.done.wait [#allocation3], 128  }
   0xa   :  { %295 = vsyncadd [#allocation3], 4294967168 }
   0xb   :  { %296 = dma.done.wait [#allocation6], 1024  }
   0xc   :  { %297 = vsyncadd [#allocation6], 4294966272  ;;  %v213_v0 = vld [vmem:[#allocation5 + $0x38] sm:$0xff]  ;;  %v212_v1 = vld [vmem:[#allocation5 + $0x30] sm:$0xff]  ;;  %s304_s24 = smov [#allocation7]   ;;  %s155_s28 = sshll.u32 %s342_s3, 4  ;;  %s156_s28 = int_to_ptr.hbm [resolvable:$true] %s155_s28 }
   0xd   :  { %131 = vmatpush.bf16.msra.mxu0 %v213_v0  ;;  %v211_v2 = vld [vmem:[#allocation5 + $0x28] sm:$0xff]  ;;  %v210_v3 = vld [vmem:[#allocation5 + $0x20] sm:$0xff]  ;;  %v209_v4 = vld [vmem:[#allocation5 + $0x18] sm:$0xff]  ;;  %s153_s25 = sshll.u32 %s304_s24, 4  ;;  %s305_s29 = smov 128   ;;  %s154_s25 = int_to_ptr.vmem [resolvable:$true] %s153_s25 }
   0xe   :  { %v208_v5 = vld [vmem:[#allocation5 + $0x10] sm:$0xff]  ;;  %v207_v6 = vld [vmem:[#allocation5 + $0x8] sm:$0xff]  ;;  %v206_v7 = vld [vmem:[#allocation5] sm:$0xff]  ;;  %s306_s30 = smov 8  }
   0xf   :  { %v205_v8 = vld [vmem:[#allocation2] sm:$0xff] }
  0x10   :  { %v221_v9 = vld [vmem:[%s341_s2] ss:$0 sm:$0xff] }
  0x11   :  { %132 = vmatpush.bf16.msra.mxu0 %v212_v1 }
  0x15   :  { %133 = vmatpush.bf16.msra.mxu0 %v211_v2 }
  0x19   :  { %134 = vmatpush.bf16.msra.mxu0 %v210_v3 }
  0x1d   :  { %135 = vmatpush.bf16.msra.mxu0 %v209_v4 }
  0x21   :  { %136 = vmatpush.bf16.msra.mxu0 %v208_v5 }
  0x25   :  { %137 = vmatpush.bf16.msra.mxu0 %v207_v6 }
  0x29   :  { %138 = vmatpush.bf16.msra.mxu0 %v206_v7 }
  0x2c   :  { %139 = vmatmul.bf16.vlgmr.msra.gmra.mxu0 %v205_v8 }
  0xa9   :  { %v140_v10 = vpop.f32.mrf.mxu0 }
  0xaa   :  { %v145_v11 = vadd.f32 %v221_v9, %v140_v10 }
  0xac   :  { %147 = vst [vmem:[#allocation7] sm:$0xff] %v145_v11 }
  0xb1   :  { %v142_v12 = vpop.f32.mrf.mxu0 }
  0xb2   :  { %v146_v13 = vadd.f32 %v221_v9, %v142_v12 }
  0xb4   :  { %148 = vst [vmem:[#allocation7 + $0x8] sm:$0xff] %v146_v13 }
  0xb5   :  { %161 = dma.vmem_to_hbm [thread:$0]  %s154_s25, 256, %s156_s28, [#allocation4], %s305_s29, %s305_s29, %s306_s30  }
  0xb6   :  { %298 = dma.done.wait [#allocation4], 256  }
  0xb7   :  { %299 = vsyncadd [#allocation4], 4294967040 }
  0xb8   :  { %166 = vsyncpa [#allocation3], 1 }
  0xb9   :  { %167 = vsyncpa [#allocation6], 1 }
  0xba   :  { %168 = vsyncpa [#allocation4], 1 }

</bundles_post_ra>
